<compile_context>
chip_gen: v5e
topology: v5e:2x2
jax: 0.10.0
libtpu: 0.0.40
codegen_flags: <defaults>
</compile_context>

<pallas_src>
from functools import partial

import jax
import jax.numpy as jnp
from jax.experimental import pallas as pl
from jax.experimental.pallas import tpu as pltpu


def _copy_kernel(src_ref, dst_ref):
    # Pure blocked copy; the "embedding lookup" is the identity block mapping
    # between the table prefix and the output.
    dst_ref[...] = src_ref[...]


def _round_up(x, m):
    return ((x + m - 1) // m) * m


def _blocked_prefix_copy(table2d, out_rows, block_rows):
    """Copy the first `out_rows` rows of `table2d` with a blocked identity kernel."""
    _, width = table2d.shape
    itemsize = jnp.dtype(table2d.dtype).itemsize
    grid = (pl.cdiv(out_rows, block_rows),)
    return pl.pallas_call(
        _copy_kernel,
        out_shape=jax.ShapeDtypeStruct((out_rows, width), table2d.dtype),
        grid=grid,
        in_specs=[pl.BlockSpec((block_rows, width), lambda i: (i, 0))],
        out_specs=pl.BlockSpec((block_rows, width), lambda i: (i, 0)),
        compiler_params=pltpu.CompilerParams(
            dimension_semantics=("parallel",)),
        cost_estimate=pl.CostEstimate(
            flops=0,
            transcendentals=0,
            bytes_accessed=2 * out_rows * width * itemsize),
    )(table2d)


@partial(jax.jit, static_argnames=("seq_len",))
def embedding_positional_encoding(pe_weight, *, seq_len):
    """Returns pe_weight[arange(seq_len)] with shape (seq_len, hidden_dim)."""
    max_len, hidden_dim = pe_weight.shape
    assert 0 < seq_len <= max_len
    itemsize = jnp.dtype(pe_weight.dtype).itemsize
    n_elems = seq_len * hidden_dim

    lane = 128
    # Minimum sublane tile per dtype packing: f32 -> 8, bf16 -> 16, int8/fp8 -> 32.
    sublane = 8 * max(1, 4 // itemsize)

    if hidden_dim % lane == 0:
        # Natural layout is already lane-dense.
        table2d = pe_weight
        width = hidden_dim
        rows_needed = seq_len
    elif (max_len * hidden_dim) % lane == 0:
        # Pack rows into 128-wide lane slabs (row-major reshape -> layout bitcast).
        table2d = pe_weight.reshape(-1, lane)
        width = lane
        rows_needed = pl.cdiv(n_elems, lane)
    else:
        # Lane-sparse fallback (masked stores); still correct.
        table2d = pe_weight
        width = hidden_dim
        rows_needed = seq_len

    total_rows = table2d.shape[0]
    row_bytes = width * itemsize

    # Biggest block under a conservative VMEM budget (~2 MiB per block; with
    # input + output double-buffered that's ~8 MiB — under the scoped VMEM
    # default on every generation: v5e 16 MiB, v6e/v7x 32 MiB).
    budget_rows = max(sublane, ((2 << 20) // row_bytes) // sublane * sublane)
    block_rows = min(budget_rows, _round_up(rows_needed, sublane))
    block_rows = max(sublane, (block_rows // sublane) * sublane)

    # Pad the copied row count up to a block multiple so every block satisfies
    # the (sublane, 128) tiling rule; the padding rows still live inside the
    # table, so the over-read is in-bounds and simply discarded afterwards.
    padded_rows = _round_up(rows_needed, block_rows)
    while padded_rows > total_rows and block_rows > sublane:
        block_rows = max(sublane, (block_rows // 2 // sublane) * sublane)
        padded_rows = _round_up(rows_needed, block_rows)
    if padded_rows > total_rows:
        # Rare corner (seq_len within one sublane tile of an unaligned table):
        # copy the whole table with a ragged last block instead.
        padded_rows = total_rows

    out2d = _blocked_prefix_copy(table2d, padded_rows, block_rows)

    if padded_rows * width == n_elems:
        # Aligned case: pure reshape, no extra copy.
        return out2d.reshape(seq_len, hidden_dim)
    # Tiny tail trim, only when alignment padding was required.
    return out2d.reshape(-1)[:n_elems].reshape(seq_len, hidden_dim)


if __name__ == "__main__":
    key = jax.random.PRNGKey(0)
    k_pe, k_x = jax.random.split(key)

    hidden_dim, max_len = 32, 1024
    batch, seq, feat = 2, 8, 32

    # Deterministic "nn.Embedding(max_len, hidden_dim)" weight (synthetic init).
    pe_weight = jax.random.normal(k_pe, (max_len, hidden_dim), dtype=jnp.float32)
    # x is only consulted for its sequence length (axis 1), as in the PyTorch module.
    x = jax.random.normal(k_x, (batch, seq, feat), dtype=jnp.float32)

    out = embedding_positional_encoding(pe_weight, seq_len=x.shape[1])
    out = jax.block_until_ready(out)

    expected = pe_weight[:seq]
    assert out.shape == (seq, hidden_dim), out.shape
    assert out.dtype == jnp.float32
    assert jnp.allclose(out, expected), "mismatch vs reference embedding lookup"
    print("KERNEL_OK")
</pallas_src>

<mosaic_0001>
module attributes {stable_mosaic.version = 11 : i64} {
  func.func @_copy_kernel(%arg0: i32, %arg1: memref<8x128xf32, #tpu.memory_space<vmem>>, %arg2: memref<8x128xf32, #tpu.memory_space<vmem>>) attributes {dimension_semantics = [#tpu.dimension_semantics<parallel>], iteration_bounds = array<i64: 1>, scalar_prefetch = 0 : i64, scratch_operands = 0 : i64, tpu.core_type = #tpu.core_type<tc>, window_params = [{transform_indices = @transform_0, window_bounds = array<i64: 8, 128>}, {transform_indices = @transform_1, window_bounds = array<i64: 8, 128>}]} {
    %c0 = arith.constant 0 : index
    %c0_0 = arith.constant 0 : index
    %0 = vector.load %arg1[%c0, %c0_0] : memref<8x128xf32, #tpu.memory_space<vmem>>, vector<8x128xf32>
    %c0_1 = arith.constant 0 : index
    %c0_2 = arith.constant 0 : index
    %1 = vector.load %arg2[%c0_1, %c0_2] : memref<8x128xf32, #tpu.memory_space<vmem>>, vector<8x128xf32>
    tpu.vector_store %arg2[%c0_1, %c0_2], %0 {strides = array<i32>} : memref<8x128xf32, #tpu.memory_space<vmem>>, vector<8x128xf32>,
    return
  }
  func.func @transform_0(%arg0: i32) -> (i32, i32) {
    %c0_i32 = arith.constant 0 : i32
    %c0_i32_0 = arith.constant 0 : i32
    return %arg0, %c0_i32 : i32, i32
  }
  func.func @transform_1(%arg0: i32) -> (i32, i32) {
    %c0_i32 = arith.constant 0 : i32
    %c0_i32_0 = arith.constant 0 : i32
    return %arg0, %c0_i32 : i32, i32
  }
}

</mosaic_0001>

<bundles_post_ra>
// kernel: embedding_positional_encoding.1
= control target key start
LH: loop header
LB: loop body
LE: loop exit
PB: predicated region body
PF: predicated region fallthrough
CT: control target
= control target key end

     0   :  { %s30_s0 = inlined_call_operand.vmem [shape: f32[256,128], index: 0, kind: input, shape index: {}]   ;;  %s31_s1 = inlined_call_operand.vmem [shape: f32[8,128], index: 1, kind: output, shape index: {}]  }
   0x1   :  { %v8_v0 = vld [vmem:[%s30_s0] sm:$0xff] }
   0x2   :  { %9 = vst [vmem:[%s31_s1] sm:$0xff] %v8_v0 }

</bundles_post_ra>
